<compile_context>
chip_gen: v7x
topology: tpu7x:2x2x1
jax: 0.10.0
libtpu: 0.0.40
codegen_flags: <defaults>
</compile_context>

<pallas_src>
import functools

import jax
import jax.numpy as jnp
from jax.experimental import pallas as pl
from jax.experimental.pallas import tpu as pltpu

EPS_SCALE = 0.0001

# Narrow f32 accumulator width (lanes): (8, 512) f32 = 4 vregs, so both
# accumulators stay register-resident across the unrolled fold loop.
_ACC_W = 512

# Max columns per input tile. tb=8 x 65536 f32 = 2 MiB/tile; 2 inputs x 2
# pipeline buffers = 8 MiB VMEM -> safe on v5e/v6e (128 MiB) and v7x (64 MiB).
_MAX_TK = 65536


def _round_up(x, m):
    return ((x + m - 1) // m) * m


def _choose_tk(m_pad, max_tk):
    """Largest multiple of _ACC_W that divides m_pad and is <= max_tk."""
    if m_pad <= max_tk:
        return m_pad
    t = (max_tk // _ACC_W) * _ACC_W
    while t > _ACC_W:
        if m_pad % t == 0:
            return t
        t -= _ACC_W
    return _ACC_W  # _ACC_W always divides m_pad


def _rmse_kernel(p_ref, l_ref, num_ref, den_ref, num_acc, den_acc, *, tk, acc_w):
    """Accumulate per-batch sum((p-l)^2) and sum(l^2) over column tiles."""
    k = pl.program_id(2)

    @pl.when(k == 0)
    def _init():
        num_acc[...] = jnp.zeros_like(num_acc)
        den_acc[...] = jnp.zeros_like(den_acc)

    # Fold this tile into the narrow accumulators via static lane-aligned
    # slices. Per chunk: 2 vector loads + a handful of VALU ops; the
    # accumulators live in vregs across the unrolled loop, so per-step VMEM
    # store traffic is just two narrow slabs (not a full-tile RMW).
    acc_n = num_acc[...]
    acc_d = den_acc[...]
    for c in range(tk // acc_w):
        sl = slice(c * acc_w, (c + 1) * acc_w)
        pc = p_ref[:, sl].astype(jnp.float32)
        lc = l_ref[:, sl].astype(jnp.float32)
        d = pc - lc
        acc_n = acc_n + d * d
        acc_d = acc_d + lc * lc
    num_acc[...] = acc_n
    den_acc[...] = acc_d

    @pl.when(k == pl.num_programs(2) - 1)
    def _finalize():
        # Single cross-lane (XLU) reduce per (split, batch-block): epilogue only.
        num_ref[...] = jnp.sum(num_acc[...], axis=1, keepdims=True)
        den_ref[...] = jnp.sum(den_acc[...], axis=1, keepdims=True)


def rmse_loss(pred, inv_lab, eps_scale=EPS_SCALE, ddf_stn=None, *, max_tk=_MAX_TK):
    # TODO(synk): ddf_stn (external spatial-transform callable) branch is not
    # translatable to a standalone kernel; only the ddf_stn=None path is kept.
    assert ddf_stn is None
    assert pred.shape == inv_lab.shape and pred.ndim == 4

    N, C, H, W = pred.shape
    M = C * H * W

    # Lane-dense 2-D layout (free view for contiguous NCHW). Inputs keep their
    # native dtype (bf16 halves HBM traffic); the kernel upcasts per chunk.
    pred2d = pred.reshape(N, M)
    lab2d = inv_lab.reshape(N, M)

    # Zero-pad columns to a multiple of _ACC_W: zeros contribute 0 to both the
    # numerator and denominator sums, so no in-kernel masking is needed.
    m_pad = _round_up(M, _ACC_W)
    if m_pad != M:
        pred2d = jnp.pad(pred2d, ((0, 0), (0, m_pad - M)))
        lab2d = jnp.pad(lab2d, ((0, 0), (0, m_pad - M)))

    # Batch tiling: tb=8 when possible; pad N to a multiple of 8 for large
    # awkward batches instead of letting the tile blow up to (N, tk).
    if N % 8 == 0:
        n_pad, tb = N, 8
    elif N < 8:
        n_pad, tb = N, N            # full (small) batch dim is a legal block
    else:
        n_pad, tb = _round_up(N, 8), 8
    if n_pad != N:
        pred2d = jnp.pad(pred2d, ((0, n_pad - N), (0, 0)))
        lab2d = jnp.pad(lab2d, ((0, n_pad - N), (0, 0)))
    nb = n_pad // tb

    tk = _choose_tk(m_pad, max_tk)
    nk = m_pad // tk

    # Split the column range across a leading parallel axis so v7x's second
    # TensorCore gets work even when the per-device batch gives nb == 1.
    splits = 2 if (nk % 2 == 0 and nk >= 2) else 1
    nkh = nk // splits

    kernel = functools.partial(_rmse_kernel, tk=tk, acc_w=_ACC_W)

    num_part, den_part = pl.pallas_call(
        kernel,
        out_shape=(
            jax.ShapeDtypeStruct((splits, n_pad, 1), jnp.float32),
            jax.ShapeDtypeStruct((splits, n_pad, 1), jnp.float32),
        ),
        grid=(splits, nb, nkh),
        in_specs=[
            # Optional tuning knob: pipeline_mode=pl.Buffered(3) if an xprof
            # trace shows exposed DMA at step boundaries.
            pl.BlockSpec((tb, tk), lambda s, b, k, nkh=nkh: (b, s * nkh + k)),
            pl.BlockSpec((tb, tk), lambda s, b, k, nkh=nkh: (b, s * nkh + k)),
        ],
        out_specs=(
            pl.BlockSpec((None, tb, 1), lambda s, b, k: (s, b, 0)),
            pl.BlockSpec((None, tb, 1), lambda s, b, k: (s, b, 0)),
        ),
        scratch_shapes=[
            pltpu.VMEM((tb, _ACC_W), jnp.float32),   # numerator accumulator
            pltpu.VMEM((tb, _ACC_W), jnp.float32),   # denominator accumulator
        ],
        compiler_params=pltpu.CompilerParams(
            dimension_semantics=("parallel", "parallel", "arbitrary"),
            vmem_limit_bytes=32 * 1024 * 1024,
        ),
    )(pred2d, lab2d)

    # Tiny combine in the wrapper: sum the column splits, drop padded batch
    # rows, turn sums into means, divide, and average over the real batch.
    inv_hw = 1.0 / float(H * W)
    num = jnp.sum(num_part, axis=0)[:N, 0] * inv_hw   # mean_{hw} sum_c (p-l)^2
    den = jnp.sum(den_part, axis=0)[:N, 0] * inv_hw   # mean_{hw} sum_c l^2
    return jnp.mean(num / (den + eps_scale))


def rmse_ref(pred, inv_lab, eps_scale=EPS_SCALE):
    """Pure-JAX reference mirroring the torch code exactly."""
    num = jnp.mean(jnp.sum(jnp.square(pred - inv_lab), axis=1), axis=(1, 2))
    den = jnp.mean(jnp.sum(jnp.square(inv_lab), axis=1), axis=(1, 2))
    return jnp.mean(num / (den + eps_scale))


if __name__ == "__main__":
    key = jax.random.PRNGKey(0)
    k1, k2, k3, k4 = jax.random.split(key, 4)

    # Demo shape implied by the module: NCHW.
    N, C, H, W = 2, 4, 16, 16
    pred = jax.random.normal(k1, (N, C, H, W), dtype=jnp.float32)
    inv_lab = jax.random.normal(k2, (N, C, H, W), dtype=jnp.float32)

    loss = rmse_loss(pred, inv_lab)
    jax.block_until_ready(loss)
    ref = rmse_ref(pred, inv_lab)
    assert jnp.allclose(loss, ref, rtol=1e-5, atol=1e-6), (loss, ref)

    # Exercise the multi-tile + column-split (megacore) path with a small tile.
    loss2 = rmse_loss(pred, inv_lab, max_tk=512)
    jax.block_until_ready(loss2)
    assert jnp.allclose(loss2, ref, rtol=1e-5, atol=1e-6), (loss2, ref)

    # Exercise batch padding (N > 8, not a multiple of 8) and column padding
    # (M not a multiple of 512).
    N2, C2, H2, W2 = 9, 3, 8, 8
    pred2 = jax.random.normal(k3, (N2, C2, H2, W2), dtype=jnp.float32)
    lab2 = jax.random.normal(k4, (N2, C2, H2, W2), dtype=jnp.float32)
    loss3 = rmse_loss(pred2, lab2)
    jax.block_until_ready(loss3)
    ref3 = rmse_ref(pred2, lab2)
    assert jnp.allclose(loss3, ref3, rtol=1e-5, atol=1e-6), (loss3, ref3)

    print("KERNEL_OK")
</pallas_src>

<mosaic_0001>
module attributes {stable_mosaic.version = 11 : i64} {
  func.func @_rmse_kernel(%arg0: i32, %arg1: i32, %arg2: i32, %arg3: memref<2x1024xf32, #tpu.memory_space<vmem>>, %arg4: memref<2x1024xf32, #tpu.memory_space<vmem>>, %arg5: memref<1x2x1xf32, #tpu.memory_space<vmem>>, %arg6: memref<1x2x1xf32, #tpu.memory_space<vmem>>, %arg7: memref<2x512xf32, #tpu.memory_space<vmem>>, %arg8: memref<2x512xf32, #tpu.memory_space<vmem>>) attributes {dimension_semantics = [#tpu.dimension_semantics<parallel>, #tpu.dimension_semantics<parallel>, #tpu.dimension_semantics<arbitrary>], iteration_bounds = array<i64: 1, 1, 1>, scalar_prefetch = 0 : i64, scratch_operands = 2 : i64, tpu.core_type = #tpu.core_type<tc>, window_params = [{transform_indices = @transform_0, window_bounds = array<i64: 2, 1024>}, {transform_indices = @transform_1, window_bounds = array<i64: 2, 1024>}, {transform_indices = @transform_2, window_bounds = array<i64: 1, 2, 1>}, {transform_indices = @transform_3, window_bounds = array<i64: 1, 2, 1>}]} {
    %c0_i32 = arith.constant 0 : i32
    %0 = arith.cmpi eq, %arg2, %c0_i32 : i32
    %1 = arith.extui %0 : i1 to i32
    %c0_i32_0 = arith.constant 0 : i32
    %2 = arith.cmpi ne, %1, %c0_i32_0 : i32
    scf.if %2 {
      %cst = arith.constant 0.000000e+00 : f32
      %24 = vector.broadcast %cst : f32 to vector<2x512xf32>
      %c0_17 = arith.constant 0 : index
      %c0_18 = arith.constant 0 : index
      %25 = vector.load %arg7[%c0_17, %c0_18] : memref<2x512xf32, #tpu.memory_space<vmem>>, vector<2x512xf32>
      tpu.vector_store %arg7[%c0_17, %c0_18], %24 {strides = array<i32>} : memref<2x512xf32, #tpu.memory_space<vmem>>, vector<2x512xf32>,
      %cst_19 = arith.constant 0.000000e+00 : f32
      %26 = vector.broadcast %cst_19 : f32 to vector<2x512xf32>
      %c0_20 = arith.constant 0 : index
      %c0_21 = arith.constant 0 : index
      %27 = vector.load %arg8[%c0_20, %c0_21] : memref<2x512xf32, #tpu.memory_space<vmem>>, vector<2x512xf32>
      tpu.vector_store %arg8[%c0_20, %c0_21], %26 {strides = array<i32>} : memref<2x512xf32, #tpu.memory_space<vmem>>, vector<2x512xf32>,
    } else {
    }
    %c0 = arith.constant 0 : index
    %c0_1 = arith.constant 0 : index
    %3 = vector.load %arg7[%c0, %c0_1] : memref<2x512xf32, #tpu.memory_space<vmem>>, vector<2x512xf32>
    %c0_2 = arith.constant 0 : index
    %c0_3 = arith.constant 0 : index
    %4 = vector.load %arg8[%c0_2, %c0_3] : memref<2x512xf32, #tpu.memory_space<vmem>>, vector<2x512xf32>
    %c0_4 = arith.constant 0 : index
    %c0_5 = arith.constant 0 : index
    %5 = vector.load %arg3[%c0_4, %c0_5] : memref<2x1024xf32, #tpu.memory_space<vmem>>, vector<2x512xf32>
    %c0_6 = arith.constant 0 : index
    %c0_7 = arith.constant 0 : index
    %6 = vector.load %arg4[%c0_6, %c0_7] : memref<2x1024xf32, #tpu.memory_space<vmem>>, vector<2x512xf32>
    %7 = arith.subf %5, %6 : vector<2x512xf32>
    %8 = arith.mulf %7, %7 : vector<2x512xf32>
    %9 = arith.addf %3, %8 : vector<2x512xf32>
    %10 = arith.mulf %6, %6 : vector<2x512xf32>
    %11 = arith.addf %4, %10 : vector<2x512xf32>
    %c0_8 = arith.constant 0 : index
    %c512 = arith.constant 512 : index
    %12 = vector.load %arg3[%c0_8, %c512] : memref<2x1024xf32, #tpu.memory_space<vmem>>, vector<2x512xf32>
    %c0_9 = arith.constant 0 : index
    %c512_10 = arith.constant 512 : index
    %13 = vector.load %arg4[%c0_9, %c512_10] : memref<2x1024xf32, #tpu.memory_space<vmem>>, vector<2x512xf32>
    %14 = arith.subf %12, %13 : vector<2x512xf32>
    %15 = arith.mulf %14, %14 : vector<2x512xf32>
    %16 = arith.addf %9, %15 : vector<2x512xf32>
    %17 = arith.mulf %13, %13 : vector<2x512xf32>
    %18 = arith.addf %11, %17 : vector<2x512xf32>
    %c0_11 = arith.constant 0 : index
    %c0_12 = arith.constant 0 : index
    %19 = vector.load %arg7[%c0_11, %c0_12] : memref<2x512xf32, #tpu.memory_space<vmem>>, vector<2x512xf32>
    tpu.vector_store %arg7[%c0_11, %c0_12], %16 {strides = array<i32>} : memref<2x512xf32, #tpu.memory_space<vmem>>, vector<2x512xf32>,
    %c0_13 = arith.constant 0 : index
    %c0_14 = arith.constant 0 : index
    %20 = vector.load %arg8[%c0_13, %c0_14] : memref<2x512xf32, #tpu.memory_space<vmem>>, vector<2x512xf32>
    tpu.vector_store %arg8[%c0_13, %c0_14], %18 {strides = array<i32>} : memref<2x512xf32, #tpu.memory_space<vmem>>, vector<2x512xf32>,
    %c0_i32_15 = arith.constant 0 : i32
    %21 = arith.cmpi eq, %arg2, %c0_i32_15 : i32
    %22 = arith.extui %21 : i1 to i32
    %c0_i32_16 = arith.constant 0 : i32
    %23 = arith.cmpi ne, %22, %c0_i32_16 : i32
    scf.if %23 {
      %c0_17 = arith.constant 0 : index
      %c0_18 = arith.constant 0 : index
      %24 = vector.load %arg7[%c0_17, %c0_18] : memref<2x512xf32, #tpu.memory_space<vmem>>, vector<2x512xf32>
      %cst = arith.constant dense<0.000000e+00> : vector<2xf32>
      %25 = vector.multi_reduction <add>, %24, %cst [1] : vector<2x512xf32> to vector<2xf32>
      %26 = vector.shape_cast %25 : vector<2xf32> to vector<2x1xf32>
      %c0_19 = arith.constant 0 : index
      %c0_20 = arith.constant 0 : index
      %c0_21 = arith.constant 0 : index
      %27 = vector.load %arg5[%c0_19, %c0_20, %c0_21] : memref<1x2x1xf32, #tpu.memory_space<vmem>>, vector<1x2x1xf32>
      %28 = vector.shape_cast %27 : vector<1x2x1xf32> to vector<2x1xf32>
      %29 = vector.shape_cast %26 : vector<2x1xf32> to vector<1x2x1xf32>
      tpu.vector_store %arg5[%c0_19, %c0_20, %c0_21], %29 {strides = array<i32>} : memref<1x2x1xf32, #tpu.memory_space<vmem>>, vector<1x2x1xf32>,
      %c0_22 = arith.constant 0 : index
      %c0_23 = arith.constant 0 : index
      %30 = vector.load %arg8[%c0_22, %c0_23] : memref<2x512xf32, #tpu.memory_space<vmem>>, vector<2x512xf32>
      %cst_24 = arith.constant dense<0.000000e+00> : vector<2xf32>
      %31 = vector.multi_reduction <add>, %30, %cst_24 [1] : vector<2x512xf32> to vector<2xf32>
      %32 = vector.shape_cast %31 : vector<2xf32> to vector<2x1xf32>
      %c0_25 = arith.constant 0 : index
      %c0_26 = arith.constant 0 : index
      %c0_27 = arith.constant 0 : index
      %33 = vector.load %arg6[%c0_25, %c0_26, %c0_27] : memref<1x2x1xf32, #tpu.memory_space<vmem>>, vector<1x2x1xf32>
      %34 = vector.shape_cast %33 : vector<1x2x1xf32> to vector<2x1xf32>
      %35 = vector.shape_cast %32 : vector<2x1xf32> to vector<1x2x1xf32>
      tpu.vector_store %arg6[%c0_25, %c0_26, %c0_27], %35 {strides = array<i32>} : memref<1x2x1xf32, #tpu.memory_space<vmem>>, vector<1x2x1xf32>,
    } else {
    }
    return
  }
  func.func @transform_0(%arg0: i32, %arg1: i32, %arg2: i32) -> (i32, i32) {
    %c1_i32 = arith.constant 1 : i32
    %0 = arith.muli %arg0, %c1_i32 : i32
    %1 = arith.addi %0, %arg2 : i32
    %c0_i32 = arith.constant 0 : i32
    return %arg1, %1 : i32, i32
  }
  func.func @transform_1(%arg0: i32, %arg1: i32, %arg2: i32) -> (i32, i32) {
    %c1_i32 = arith.constant 1 : i32
    %0 = arith.muli %arg0, %c1_i32 : i32
    %1 = arith.addi %0, %arg2 : i32
    %c0_i32 = arith.constant 0 : i32
    return %arg1, %1 : i32, i32
  }
  func.func @transform_2(%arg0: i32, %arg1: i32, %arg2: i32) -> (i32, i32, i32) {
    %c0_i32 = arith.constant 0 : i32
    %c0_i32_0 = arith.constant 0 : i32
    return %arg0, %arg1, %c0_i32 : i32, i32, i32
  }
  func.func @transform_3(%arg0: i32, %arg1: i32, %arg2: i32) -> (i32, i32, i32) {
    %c0_i32 = arith.constant 0 : i32
    %c0_i32_0 = arith.constant 0 : i32
    return %arg0, %arg1, %c0_i32 : i32, i32, i32
  }
}

</mosaic_0001>

<bundles_post_ra>
// kernel: tpu_custom_call.1
= control target key start
LH: loop header
LB: loop body
LE: loop exit
PB: predicated region body
PF: predicated region fallthrough
CT: control target
= control target key end

     0   :  { %9 = vsyncpa [#allocation5], 0  ;;  %s266_s0 = inlined_call_operand.hbm [shape: f32[2,1024], index: 0, kind: input, shape index: {}]   ;;  %s267_s1 = inlined_call_operand.hbm [shape: f32[2,1024], index: 1, kind: input, shape index: {}]   ;;  %s268_s2 = inlined_call_operand.vmem [shape: f32[1,2,1], index: 2, kind: output, shape index: {0}]   ;;  %s269_s3 = inlined_call_operand.vmem [shape: f32[1,2,1], index: 3, kind: output, shape index: {1}]  }
   0x1   :  { %10 = vsyncpa [#allocation7], 0  ;;  %s205_s12 = smov [#allocation4]   ;;  %s206_s14 = smov [#allocation6]  }
   0x2   :  { %s21_s13 = sshll.u32 %s205_s12, 4  ;;  %s35_s15 = sshll.u32 %s206_s14, 4  ;;  %s22_s13 = int_to_ptr.vmem [resolvable:$true] %s21_s13  ;;  %s36_s15 = int_to_ptr.vmem [resolvable:$true] %s35_s15 }
   0x3   :  { %s157_s18 = scalar_lea.hbm %s266_s0, 256 }
   0x4   :  { %p158_p0 = scmp.ne.s32.totalorder %s266_s0, %s157_s18  ;;  %p161_p1 = scmp.lt.u32.totalorder %s157_s18, %s266_s0 }
   0x6   :  { %p163_p2 = pnand %p161_p1, %p158_p0 }
   0x8   :  { %166 = shalt.err (!%p163_p2)
}
   0x9   :  { %s167_s23 = scalar_lea.vmem %s22_s13, 256  ;;  %p172_p4 = scmp.lt.s32.totalorder %s22_s13, %s22_s13 }
   0xa   :  { %p168_p3 = scmp.ne.s32.totalorder %s22_s13, %s167_s23  ;;  %p173_p5 = scmp.lt.s32.totalorder %s167_s23, %s167_s23 }
   0xc   :  { %p174_p6 = por %p173_p5, %p172_p4 }
   0xe   :  { %p175_p7 = pnand %p174_p6, %p168_p3 }
  0x10   :  { %178 = shalt.err (!%p175_p7)
}
  0x11   :  { %24 = dma.hbm_to_vmem [thread:$0]  %s266_s0, 256, %s22_s13, [#allocation5]  }
  0x12   :  { %s179_s28 = scalar_lea.hbm %s267_s1, 256 }
  0x13   :  { %p180_p8 = scmp.ne.s32.totalorder %s267_s1, %s179_s28  ;;  %p183_p9 = scmp.lt.u32.totalorder %s179_s28, %s267_s1 }
  0x15   :  { %p185_p10 = pnand %p183_p9, %p180_p8 }
  0x17   :  { %188 = shalt.err (!%p185_p10)
}
  0x18   :  { %s189_s6 = scalar_lea.vmem %s36_s15, 256  ;;  %p194_p12 = scmp.lt.s32.totalorder %s36_s15, %s36_s15 }
  0x19   :  { %p190_p11 = scmp.ne.s32.totalorder %s36_s15, %s189_s6  ;;  %p195_p13 = scmp.lt.s32.totalorder %s189_s6, %s189_s6 }
  0x1b   :  { %p196_p0 = por %p195_p13, %p194_p12 }
  0x1d   :  { %p197_p1 = pnand %p196_p0, %p190_p11 }
  0x1f   :  { %200 = shalt.err (!%p197_p1)
}
  0x20   :  { %38 = dma.hbm_to_vmem [thread:$0]  %s267_s1, 256, %s36_s15, [#allocation7]  }
  0x21   :  { %201 = dma.done.wait [#allocation5], 256  }
  0x22   :  { %202 = vsyncadd [#allocation5], 4294967040 }
  0x23   :  { %203 = dma.done.wait [#allocation7], 256  }
  0x24   :  { %204 = vsyncadd [#allocation7], 4294967040  ;;  %v207_v0 = vmov 1983009808   ;;  %v82_v2 = vlaneseq  ;;  %v57_v3 = vld [vmem:[#allocation4] sm:$0xff]  ;;  %v58_v4 = vld [vmem:[#allocation6] sm:$0xff] }
  0x25   :  { %v80_v1 = vunpack.c.l.s4 %v207_v0  ;;  %v64_v5 = vld [vmem:[#allocation4 + $0x8] sm:$0xff]  ;;  %v59_v8 = vsub.f32 %v57_v3, %v58_v4  ;;  %v65_v9 = vld [vmem:[#allocation6 + $0x8] sm:$0xff]  ;;  %v62_v10 = vmul.f32 %v58_v4, %v58_v4  ;;  %vm99_vm0 = vcmask 1041408  }
  0x26   :  { %v83_v7 = vshrl.u32 %v82_v2, 7  ;;  %v66_v11 = vsub.f32 %v64_v5, %v65_v9  ;;  %v69_v12 = vmul.f32 %v65_v9, %v65_v9  ;;  %vm109_vm1 = vcmask 1024  }
  0x27   :  { %v81_v6 = vunpack.c.0.s8 %v80_v1  ;;  %v60_v13 = vmul.f32 %v59_v8, %v59_v8 }
  0x28   :  { %v67_v14 = vmul.f32 %v66_v11, %v66_v11  ;;  %v70_v16 = vadd.f32 %v69_v12, %v62_v10 }
  0x29   :  { %v84_v15 = vsub.s32 %v81_v6, %v83_v7 }
  0x2a   :  { %v68_v17 = vadd.f32 %v67_v14, %v60_v13  ;;  %v113_v18 = vcombine.high %v70_v16, %v70_v16 }
  0x2b   :  { %v120_v19 = vrot.slane %v70_v16, %v84_v15 }
  0x2c   :  { %v78_v20 = vcombine.high %v68_v17, %v68_v17  ;;  %v85_v21 = vrot.slane %v68_v17, %v84_v15  ;;  %v127_v22 = vrot.slane %v113_v18, %v84_v15 }
  0x2d   :  { %v128_v23 = vcombine.high %v120_v19, %v120_v19  ;;  %v134_v24 = vsel %vm99_vm0, %v120_v19, 0.0 }
  0x2e   :  { %v92_v25 = vrot.slane %v78_v20, %v84_v15  ;;  %v93_v26 = vcombine.high %v85_v21, %v85_v21  ;;  %v100_v27 = vsel %vm99_vm0, %v85_v21, 0.0  ;;  %v129_v28 = vcombine.high %v127_v22, %v127_v22 }
  0x2f   :  { %v135_v29 = vsel %vm99_vm0, %v128_v23, 0.0  ;;  %v137_v30 = vsel %vm99_vm0, %v127_v22, 0.0 }
  0x30   :  { %v94_v31 = vcombine.high %v92_v25, %v92_v25  ;;  %v101_v32 = vsel %vm99_vm0, %v93_v26, 0.0  ;;  %v103_v33 = vsel %vm99_vm0, %v92_v25, 0.0  ;;  %v136_v34 = vadd.f32 %v135_v29, %v134_v24 }
  0x31   :  { %v102_v35 = vadd.f32 %v101_v32, %v100_v27  ;;  %v139_v39 = vsel %vm99_vm0, %v129_v28, 0.0 }
  0x32   :  { %v105_v36 = vsel %vm99_vm0, %v94_v31, 0.0  ;;  %v138_v38 = vadd.f32 %v137_v30, %v136_v34 }
  0x33   :  { %v104_v37 = vadd.f32 %v103_v33, %v102_v35 }
  0x34   :  { %v140_v41 = vadd.f32 %v139_v39, %v138_v38 }
  0x35   :  { %v106_v40 = vadd.f32 %v105_v36, %v104_v37 }
  0x37   :  { %107 = vadd.xlane.f32.xlu0 %v106_v40 }
  0x3b   :  { %141 = vadd.xlane.f32.xlu0 %v140_v41 }
  0xc4   :  { %v108_v42 = vpop.xlane.xlu0 %107 }
  0xc5   :  { %110 = vst.msk [vmem:[%s268_s2] sm:$0x3] %vm109_vm1, %v108_v42 }
  0xc8   :  { %v142_v43 = vpop.xlane.xlu0 %141 }
  0xc9   :  { %143 = vst.msk [vmem:[%s269_s3] sm:$0x3] %vm109_vm1, %v142_v43 }
  0xca   :  { %152 = vsyncpa [#allocation5], 1 }
  0xcb   :  { %153 = vsyncpa [#allocation7], 1 }

</bundles_post_ra>
